<compile_context>
chip_gen: v7x
topology: tpu7x:2x2x1
jax: 0.10.0
libtpu: 0.0.40
codegen_flags: <defaults>
</compile_context>

<pallas_src>
import jax
import jax.numpy as jnp
from jax import lax
from jax.experimental import pallas as pl
from jax.experimental.pallas import tpu as pltpu

LANE_PAD = 128   # hidden dims (40/50/60) zero-padded to one full lane width


def _round_up(n, m):
    return ((n + m - 1) // m) * m


def ann_kernel(x_ref, w1_ref, b1_ref, w2_ref, b2_ref,
               w3_ref, b3_ref, w4t_ref, b4_ref, out_ref):
    """One (TILE_B, 30) block of x -> one lane-dense (1, TILE_B) output block."""
    cd = w1_ref.dtype                       # compute dtype (bf16 fast path or f32)
    x = x_ref[...]                          # (TILE_B, 30), already in cd

    # Hidden layers: MXU matmul (f32 accumulation) + f32 bias + ReLU, then cast
    # back to the compute dtype so the *next* matmul runs on the native MXU path.
    h = jnp.maximum(
        jnp.dot(x, w1_ref[...], preferred_element_type=jnp.float32) + b1_ref[...], 0.0)
    h = jnp.maximum(
        jnp.dot(h.astype(cd), w2_ref[...], preferred_element_type=jnp.float32)
        + b2_ref[...], 0.0)
    h = jnp.maximum(
        jnp.dot(h.astype(cd), w3_ref[...], preferred_element_type=jnp.float32)
        + b3_ref[...], 0.0)

    # Final layer: contract on h's last dim -> (1, TILE_B) without materializing
    # h.T (no XLU transpose, no extra VMEM copy).  Batch rides the lane axis, so
    # the store below is a full, unmasked lane-dense slab.
    y = lax.dot_general(
        w4t_ref[...], h.astype(cd),
        dimension_numbers=(((1,), (1,)), ((), ())),
        preferred_element_type=jnp.float32) + b4_ref[...]
    out_ref[...] = y.astype(out_ref.dtype)


def ann_forward(x, padded_params, *, tile_b=4096):
    """x: (B, 30). padded_params: output of prepare_params(). Returns (B, 1) f32."""
    B, d_in = x.shape
    p = padded_params
    cd = p["w1"].dtype
    if x.dtype != cd:
        x = x.astype(cd)            # one-time cast (bf16 fast path halves x traffic)

    # Tile: multiple of 128 (lane-dense output blocks).  Cap so the grid has at
    # least 2 steps whenever B > 128 -> both TensorCores engage on v7x.
    max_tile = _round_up(pl.cdiv(B, 2), 128)
    tile_b = max(128, min(_round_up(int(tile_b), 128), max_tile))
    grid = (pl.cdiv(B, tile_b),)    # ragged tail handled by Pallas block masking

    weights = (p["w1"], p["b1"], p["w2"], p["b2"],
               p["w3"], p["b3"], p["w4t"], p["b4"])

    # Constant index_map -> weights (~22 KB) fetched once, VMEM-resident.
    def resident(a):
        return pl.BlockSpec(a.shape, lambda i: (0,) * a.ndim)

    flops = 2 * B * (d_in * LANE_PAD + 2 * LANE_PAD * LANE_PAD + LANE_PAD)
    bytes_accessed = (B * d_in * x.dtype.itemsize
                      + sum(int(w.size) * w.dtype.itemsize for w in weights)
                      + B * 4)

    out = pl.pallas_call(
        ann_kernel,
        out_shape=jax.ShapeDtypeStruct((1, B), jnp.float32),
        grid=grid,
        in_specs=[pl.BlockSpec((tile_b, d_in), lambda i: (i, 0))]
                 + [resident(a) for a in weights],
        out_specs=pl.BlockSpec((1, tile_b), lambda i: (0, i)),
        compiler_params=pltpu.CompilerParams(
            dimension_semantics=("parallel",),
            vmem_limit_bytes=48 * 1024 * 1024),
        cost_estimate=pl.CostEstimate(
            flops=flops, transcendentals=0, bytes_accessed=bytes_accessed),
    )(x, *weights)

    return out.reshape(B, 1)


def init_params(key):
    """torch.nn.Linear-style init: U(-1/sqrt(fan_in), 1/sqrt(fan_in)).
    Stored (in_features, out_features) so the hot path is row-major matmuls."""
    dims = [(30, 40), (40, 50), (50, 60), (60, 1)]
    params = {}
    for i, (fan_in, fan_out) in enumerate(dims, start=1):
        key, kw, kb = jax.random.split(key, 3)
        bound = 1.0 / jnp.sqrt(jnp.float32(fan_in))
        params[f"w{i}"] = jax.random.uniform(
            kw, (fan_in, fan_out), jnp.float32, minval=-bound, maxval=bound)
        params[f"b{i}"] = jax.random.uniform(
            kb, (1, fan_out), jnp.float32, minval=-bound, maxval=bound)
    return params


def prepare_params(params, pad_to=LANE_PAD, dtype=jnp.bfloat16):
    """One-time host-side prep: zero-pad hidden dims to a full lane width (exact:
    padded activations are ReLU(0)=0 and padded weight rows are 0), store the
    final layer's weight transposed as a (1, 128) row for the lane-dense tail,
    and cast weights to `dtype` (bf16 fast path); biases stay f32."""
    def pad2(a, rows, cols):
        return jnp.pad(a, ((0, rows - a.shape[0]), (0, cols - a.shape[1])))

    w1, b1 = params["w1"], params["b1"]   # (30, 40), (1, 40)
    w2, b2 = params["w2"], params["b2"]   # (40, 50), (1, 50)
    w3, b3 = params["w3"], params["b3"]   # (50, 60), (1, 60)
    w4, b4 = params["w4"], params["b4"]   # (60, 1),  (1, 1)
    h = pad_to
    return {
        "w1": pad2(w1, w1.shape[0], h).astype(dtype),
        "b1": pad2(b1, 1, h).astype(jnp.float32),
        "w2": pad2(w2, h, h).astype(dtype),
        "b2": pad2(b2, 1, h).astype(jnp.float32),
        "w3": pad2(w3, h, h).astype(dtype),
        "b3": pad2(b3, 1, h).astype(jnp.float32),
        "w4t": pad2(w4.T, 1, h).astype(dtype),
        "b4": b4.astype(jnp.float32),
    }


def reference_forward(x, params):
    """Plain f32 reference matching the PyTorch module's eval forward."""
    h = jnp.maximum(x @ params["w1"] + params["b1"], 0.0)
    h = jnp.maximum(h @ params["w2"] + params["b2"], 0.0)
    h = jnp.maximum(h @ params["w3"] + params["b3"], 0.0)
    return h @ params["w4"] + params["b4"]


def reference_forward_quantized(x, params, dtype):
    """Reference mimicking the kernel's low-precision-input / f32-accumulate path."""
    def d(a, b):
        return jnp.dot(a.astype(dtype), b.astype(dtype),
                       preferred_element_type=jnp.float32)
    h = jnp.maximum(d(x, params["w1"]) + params["b1"], 0.0)
    h = jnp.maximum(d(h, params["w2"]) + params["b2"], 0.0)
    h = jnp.maximum(d(h, params["w3"]) + params["b3"], 0.0)
    return d(h, params["w4"]) + params["b4"]


if __name__ == "__main__":
    key = jax.random.PRNGKey(0)
    k_params, k_x1, k_x2 = jax.random.split(key, 3)
    raw_params = init_params(k_params)

    # (a) Exactness check: f32 params, tiny batch (B=8, features=30).
    params_f32 = prepare_params(raw_params, dtype=jnp.float32)
    x_small = jax.random.normal(k_x1, (8, 30), jnp.float32)
    out_small = jax.block_until_ready(ann_forward(x_small, params_f32))
    ref_small = reference_forward(x_small, raw_params)
    assert out_small.shape == (8, 1), out_small.shape
    assert jnp.allclose(out_small, ref_small, atol=1e-4, rtol=1e-4), "f32 mismatch"

    # (b) Fast path: bf16 params/x, batch exercising a multi-step grid with a
    #     ragged (masked) last block and no host-side padding of x.
    params_bf16 = prepare_params(raw_params, dtype=jnp.bfloat16)
    x_big = jax.random.normal(k_x2, (300, 30), jnp.float32)
    out_big = jax.block_until_ready(ann_forward(x_big, params_bf16, tile_b=4096))
    ref_big = reference_forward_quantized(x_big, raw_params, jnp.bfloat16)
    assert out_big.shape == (300, 1), out_big.shape
    assert jnp.allclose(out_big, ref_big, atol=2e-2, rtol=2e-2), "bf16 mismatch"

    print("KERNEL_OK")
</pallas_src>

<mosaic_0001>
module attributes {stable_mosaic.version = 11 : i64} {
  func.func @ann_kernel(%arg0: i32, %arg1: memref<128x30xf32, #tpu.memory_space<vmem>>, %arg2: memref<30x128xf32, #tpu.memory_space<vmem>>, %arg3: memref<1x128xf32, #tpu.memory_space<vmem>>, %arg4: memref<128x128xf32, #tpu.memory_space<vmem>>, %arg5: memref<1x128xf32, #tpu.memory_space<vmem>>, %arg6: memref<128x128xf32, #tpu.memory_space<vmem>>, %arg7: memref<1x128xf32, #tpu.memory_space<vmem>>, %arg8: memref<1x128xf32, #tpu.memory_space<vmem>>, %arg9: memref<1x1xf32, #tpu.memory_space<vmem>>, %arg10: memref<1x128xf32, #tpu.memory_space<vmem>>) attributes {dimension_semantics = [#tpu.dimension_semantics<parallel>], iteration_bounds = array<i64: 1>, scalar_prefetch = 0 : i64, scratch_operands = 0 : i64, tpu.core_type = #tpu.core_type<tc>, window_params = [{transform_indices = @transform_0, window_bounds = array<i64: 128, 30>}, {pipeline_mode = #tpu.pipeline_mode<synchronous>, transform_indices = @transform_1, window_bounds = array<i64: 30, 128>}, {pipeline_mode = #tpu.pipeline_mode<synchronous>, transform_indices = @transform_2, window_bounds = array<i64: 1, 128>}, {pipeline_mode = #tpu.pipeline_mode<synchronous>, transform_indices = @transform_3, window_bounds = array<i64: 128, 128>}, {pipeline_mode = #tpu.pipeline_mode<synchronous>, transform_indices = @transform_4, window_bounds = array<i64: 1, 128>}, {pipeline_mode = #tpu.pipeline_mode<synchronous>, transform_indices = @transform_5, window_bounds = array<i64: 128, 128>}, {pipeline_mode = #tpu.pipeline_mode<synchronous>, transform_indices = @transform_6, window_bounds = array<i64: 1, 128>}, {pipeline_mode = #tpu.pipeline_mode<synchronous>, transform_indices = @transform_7, window_bounds = array<i64: 1, 128>}, {pipeline_mode = #tpu.pipeline_mode<synchronous>, transform_indices = @transform_8, window_bounds = array<i64: 1, 1>}, {transform_indices = @transform_9, window_bounds = array<i64: 1, 128>}]} {
    %c0 = arith.constant 0 : index
    %c0_0 = arith.constant 0 : index
    %0 = vector.load %arg1[%c0, %c0_0] : memref<128x30xf32, #tpu.memory_space<vmem>>, vector<128x30xf32>
    %c0_1 = arith.constant 0 : index
    %c0_2 = arith.constant 0 : index
    %1 = vector.load %arg2[%c0_1, %c0_2] : memref<30x128xf32, #tpu.memory_space<vmem>>, vector<30x128xf32>
    %cst = arith.constant dense<0.000000e+00> : vector<128x128xf32>
    %2 = tpu.matmul %0, %1, %cst {dimension_numbers = #tpu.dot_dimension_numbers<[1], [0], [0], [1], [0, 0, 1, 1], [], []>} : vector<128x30xf32>, vector<30x128xf32>, vector<128x128xf32> -> vector<128x128xf32>
    %c0_3 = arith.constant 0 : index
    %c0_4 = arith.constant 0 : index
    %3 = vector.load %arg3[%c0_3, %c0_4] : memref<1x128xf32, #tpu.memory_space<vmem>>, vector<1x128xf32>
    %4 = vector.broadcast %3 : vector<1x128xf32> to vector<128x128xf32>
    %5 = arith.addf %2, %4 : vector<128x128xf32>
    %cst_5 = arith.constant 0.000000e+00 : f32
    %6 = vector.broadcast %cst_5 : f32 to vector<128x128xf32>
    %7 = arith.maximumf %5, %6 : vector<128x128xf32>
    %c0_6 = arith.constant 0 : index
    %c0_7 = arith.constant 0 : index
    %8 = vector.load %arg4[%c0_6, %c0_7] : memref<128x128xf32, #tpu.memory_space<vmem>>, vector<128x128xf32>
    %cst_8 = arith.constant dense<0.000000e+00> : vector<128x128xf32>
    %9 = tpu.matmul %7, %8, %cst_8 {dimension_numbers = #tpu.dot_dimension_numbers<[1], [0], [0], [1], [0, 0, 1, 1], [], []>} : vector<128x128xf32>, vector<128x128xf32>, vector<128x128xf32> -> vector<128x128xf32>
    %c0_9 = arith.constant 0 : index
    %c0_10 = arith.constant 0 : index
    %10 = vector.load %arg5[%c0_9, %c0_10] : memref<1x128xf32, #tpu.memory_space<vmem>>, vector<1x128xf32>
    %11 = vector.broadcast %10 : vector<1x128xf32> to vector<128x128xf32>
    %12 = arith.addf %9, %11 : vector<128x128xf32>
    %cst_11 = arith.constant 0.000000e+00 : f32
    %13 = vector.broadcast %cst_11 : f32 to vector<128x128xf32>
    %14 = arith.maximumf %12, %13 : vector<128x128xf32>
    %c0_12 = arith.constant 0 : index
    %c0_13 = arith.constant 0 : index
    %15 = vector.load %arg6[%c0_12, %c0_13] : memref<128x128xf32, #tpu.memory_space<vmem>>, vector<128x128xf32>
    %cst_14 = arith.constant dense<0.000000e+00> : vector<128x128xf32>
    %16 = tpu.matmul %14, %15, %cst_14 {dimension_numbers = #tpu.dot_dimension_numbers<[1], [0], [0], [1], [0, 0, 1, 1], [], []>} : vector<128x128xf32>, vector<128x128xf32>, vector<128x128xf32> -> vector<128x128xf32>
    %c0_15 = arith.constant 0 : index
    %c0_16 = arith.constant 0 : index
    %17 = vector.load %arg7[%c0_15, %c0_16] : memref<1x128xf32, #tpu.memory_space<vmem>>, vector<1x128xf32>
    %18 = vector.broadcast %17 : vector<1x128xf32> to vector<128x128xf32>
    %19 = arith.addf %16, %18 : vector<128x128xf32>
    %cst_17 = arith.constant 0.000000e+00 : f32
    %20 = vector.broadcast %cst_17 : f32 to vector<128x128xf32>
    %21 = arith.maximumf %19, %20 : vector<128x128xf32>
    %c0_18 = arith.constant 0 : index
    %c0_19 = arith.constant 0 : index
    %22 = vector.load %arg8[%c0_18, %c0_19] : memref<1x128xf32, #tpu.memory_space<vmem>>, vector<1x128xf32>
    %cst_20 = arith.constant dense<0.000000e+00> : vector<1x128xf32>
    %23 = tpu.matmul %22, %21, %cst_20 {dimension_numbers = #tpu.dot_dimension_numbers<[1], [1], [0], [0], [0, 0, 1, 0], [], []>} : vector<1x128xf32>, vector<128x128xf32>, vector<1x128xf32> -> vector<1x128xf32>
    %c0_21 = arith.constant 0 : index
    %c0_22 = arith.constant 0 : index
    %24 = vector.load %arg9[%c0_21, %c0_22] : memref<1x1xf32, #tpu.memory_space<vmem>>, vector<1x1xf32>
    %25 = vector.broadcast %24 : vector<1x1xf32> to vector<1x128xf32>
    %26 = arith.addf %23, %25 : vector<1x128xf32>
    %c0_23 = arith.constant 0 : index
    %c0_24 = arith.constant 0 : index
    %27 = vector.load %arg10[%c0_23, %c0_24] : memref<1x128xf32, #tpu.memory_space<vmem>>, vector<1x128xf32>
    tpu.vector_store %arg10[%c0_23, %c0_24], %26 {strides = array<i32>} : memref<1x128xf32, #tpu.memory_space<vmem>>, vector<1x128xf32>,
    return
  }
  func.func @transform_0(%arg0: i32) -> (i32, i32) {
    %c0_i32 = arith.constant 0 : i32
    %c0_i32_0 = arith.constant 0 : i32
    return %arg0, %c0_i32 : i32, i32
  }
  func.func @transform_1(%arg0: i32) -> (i32, i32) {
    %c0_i32 = arith.constant 0 : i32
    %c0_i32_0 = arith.constant 0 : i32
    %c0_i32_1 = arith.constant 0 : i32
    return %c0_i32, %c0_i32_0 : i32, i32
  }
  func.func @transform_2(%arg0: i32) -> (i32, i32) {
    %c0_i32 = arith.constant 0 : i32
    %c0_i32_0 = arith.constant 0 : i32
    %c0_i32_1 = arith.constant 0 : i32
    return %c0_i32, %c0_i32_0 : i32, i32
  }
  func.func @transform_3(%arg0: i32) -> (i32, i32) {
    %c0_i32 = arith.constant 0 : i32
    %c0_i32_0 = arith.constant 0 : i32
    %c0_i32_1 = arith.constant 0 : i32
    return %c0_i32, %c0_i32_0 : i32, i32
  }
  func.func @transform_4(%arg0: i32) -> (i32, i32) {
    %c0_i32 = arith.constant 0 : i32
    %c0_i32_0 = arith.constant 0 : i32
    %c0_i32_1 = arith.constant 0 : i32
    return %c0_i32, %c0_i32_0 : i32, i32
  }
  func.func @transform_5(%arg0: i32) -> (i32, i32) {
    %c0_i32 = arith.constant 0 : i32
    %c0_i32_0 = arith.constant 0 : i32
    %c0_i32_1 = arith.constant 0 : i32
    return %c0_i32, %c0_i32_0 : i32, i32
  }
  func.func @transform_6(%arg0: i32) -> (i32, i32) {
    %c0_i32 = arith.constant 0 : i32
    %c0_i32_0 = arith.constant 0 : i32
    %c0_i32_1 = arith.constant 0 : i32
    return %c0_i32, %c0_i32_0 : i32, i32
  }
  func.func @transform_7(%arg0: i32) -> (i32, i32) {
    %c0_i32 = arith.constant 0 : i32
    %c0_i32_0 = arith.constant 0 : i32
    %c0_i32_1 = arith.constant 0 : i32
    return %c0_i32, %c0_i32_0 : i32, i32
  }
  func.func @transform_8(%arg0: i32) -> (i32, i32) {
    %c0_i32 = arith.constant 0 : i32
    %c0_i32_0 = arith.constant 0 : i32
    %c0_i32_1 = arith.constant 0 : i32
    return %c0_i32, %c0_i32_0 : i32, i32
  }
  func.func @transform_9(%arg0: i32) -> (i32, i32) {
    %c0_i32 = arith.constant 0 : i32
    %c0_i32_0 = arith.constant 0 : i32
    return %c0_i32, %arg0 : i32, i32
  }
}

</mosaic_0001>

<bundles_post_ra>
// kernel: tpu_custom_call.1
= control target key start
LH: loop header
LB: loop body
LE: loop exit
PB: predicated region body
PF: predicated region fallthrough
CT: control target
= control target key end

     0   :  { %s1515_s0 = inlined_call_operand.hbm [shape: f32[8,30], index: 0, kind: input, shape index: {}]   ;;  %s1516_s1 = inlined_call_operand.hbm [shape: f32[30,128], index: 1, kind: input, shape index: {}]   ;;  %s1517_s2 = inlined_call_operand.vmem [shape: f32[1,128], index: 2, kind: input, shape index: {}]   ;;  %s1518_s3 = inlined_call_operand.hbm [shape: f32[128,128], index: 3, kind: input, shape index: {}]   ;;  %s1519_s4 = inlined_call_operand.vmem [shape: f32[1,128], index: 4, kind: input, shape index: {}]   ;;  %s1520_s5 = inlined_call_operand.hbm [shape: f32[128,128], index: 5, kind: input, shape index: {}]   ;;  %s1521_s6 = inlined_call_operand.vmem [shape: f32[1,128], index: 6, kind: input, shape index: {}]   ;;  %s1522_s7 = inlined_call_operand.vmem [shape: f32[1,128], index: 7, kind: input, shape index: {}]   ;;  %s1523_s8 = inlined_call_operand.<no memory space> [shape: f32[1,1], index: 8, kind: input, shape index: {}]   ;;  %s1524_s9 = inlined_call_operand.hbm [shape: f32[1,8], index: 9, kind: output, shape index: {}]  }
   0x1   :  { %v14_v0 = vstv %s1523_s8 }
   0x2   :  { %15 = vst [vmem:[#allocation2] sm:$0x1] %v14_v0 }
   0x3   :  { %16 = vsyncpa [#allocation4], 0 }
   0x4   :  { %17 = vsyncpa [#allocation7], 0 }
   0x5   :  { %18 = vsyncpa [#allocation10], 0 }
   0x6   :  { %19 = vsyncpa [#allocation5], 0 }
   0x7   :  { %24 = vsyncadd [#allocation4], 1920  ;;  %s1327_s11 = smov [#allocation6]   ;;  %s1328_s13 = smov [#allocation3]  }
   0x8   :  { %s37_s12 = sshll.u32 %s1327_s11, 4  ;;  %s25_s14 = sshll.u32 %s1328_s13, 4  ;;  %s38_s12 = int_to_ptr.vmem [resolvable:$true] %s37_s12  ;;  %s1392_s14 = int_to_ptr.vmem [resolvable:$true] %s25_s14 }
   0x9   :  { %s1209_s17 = scalar_lea.hbm %s1516_s1, 512 }
   0xa   :  { %p1210_p0 = scmp.ne.s32.totalorder %s1516_s1, %s1209_s17  ;;  %p1213_p1 = scmp.lt.u32.totalorder %s1209_s17, %s1516_s1 }
   0xc   :  { %p1215_p2 = pnand %p1213_p1, %p1210_p0 }
   0xe   :  { %1218 = shalt.err (!%p1215_p2)
}
   0xf   :  { %s1219_s21 = scalar_lea.vmem %s38_s12, 512  ;;  %p1224_p4 = scmp.lt.s32.totalorder %s38_s12, %s38_s12 }
  0x10   :  { %p1220_p3 = scmp.ne.s32.totalorder %s38_s12, %s1219_s21  ;;  %p1225_p5 = scmp.lt.s32.totalorder %s1219_s21, %s1219_s21 }
  0x12   :  { %p1226_p6 = por %p1225_p5, %p1224_p4 }
  0x14   :  { %p1227_p7 = pnand %p1226_p6, %p1220_p3 }
  0x16   :  { %1230 = shalt.err (!%p1227_p7)
}
  0x17   :  { %s1329_s22 = smov 128   ;;  %s1330_s23 = smov 8  }
  0x18   :  { %43 = dma.hbm_to_vmem [thread:$0]  %s1516_s1, 512, %s38_s12, [#allocation7], %s1329_s22, %s1329_s22, %s1330_s23  }
  0x19   :  { %s1231_s28 = scalar_lea.hbm %s1515_s0, 128 }
  0x1a   :  { %p1232_p8 = scmp.ne.s32.totalorder %s1515_s0, %s1231_s28  ;;  %p1235_p9 = scmp.lt.u32.totalorder %s1231_s28, %s1515_s0 }
  0x1c   :  { %p1237_p10 = pnand %p1235_p9, %p1232_p8 }
  0x1e   :  { %1240 = shalt.err (!%p1237_p10)
}
  0x1f   :  { %s1241_s13 = scalar_lea.vmem %s1392_s14, 128  ;;  %s1245_s1 = scalar_lea.vmem %s1392_s14, 2048 }
  0x20   :  { %p1242_p11 = scmp.ne.s32.totalorder %s1392_s14, %s1241_s13  ;;  %p1246_p12 = scmp.lt.s32.totalorder %s1392_s14, %s1392_s14 }
  0x21   :  { %p1247_p13 = scmp.lt.s32.totalorder %s1245_s1, %s1241_s13 }
  0x23   :  { %p1248_p0 = por %p1247_p13, %p1246_p12 }
  0x25   :  { %p1249_p1 = pnand %p1248_p0, %p1242_p11 }
  0x27   :  { %1252 = shalt.err (!%p1249_p1)
}
  0x28   :  { %31 = dma.hbm_to_vmem [thread:$0]  %s1515_s0, 128, %s1392_s14, [#allocation4], %s1329_s22, %s1329_s22, %s1330_s23  }
  0x29   :  { %s1331_s16 = smov [#allocation8]   ;;  %s1332_s18 = smov [#allocation9]  }
  0x2a   :  { %s51_s17 = sshll.u32 %s1331_s16, 4  ;;  %s65_s19 = sshll.u32 %s1332_s18, 4  ;;  %s52_s17 = int_to_ptr.vmem [resolvable:$true] %s51_s17  ;;  %s1430_s19 = int_to_ptr.vmem [resolvable:$true] %s65_s19 }
  0x2b   :  { %s1253_s21 = scalar_lea.hbm %s1518_s3, 2048 }
  0x2c   :  { %p1254_p2 = scmp.ne.s32.totalorder %s1518_s3, %s1253_s21  ;;  %p1257_p3 = scmp.lt.u32.totalorder %s1253_s21, %s1518_s3 }
  0x2e   :  { %p1259_p4 = pnand %p1257_p3, %p1254_p2 }
  0x30   :  { %1262 = shalt.err (!%p1259_p4)
}
  0x31   :  { %s1263_s0 = scalar_lea.vmem %s52_s17, 2048  ;;  %p1268_p6 = scmp.lt.s32.totalorder %s52_s17, %s52_s17 }
  0x32   :  { %p1264_p5 = scmp.ne.s32.totalorder %s52_s17, %s1263_s0  ;;  %p1269_p7 = scmp.lt.s32.totalorder %s1263_s0, %s1263_s0 }
  0x34   :  { %p1270_p8 = por %p1269_p7, %p1268_p6 }
  0x36   :  { %p1271_p9 = pnand %p1270_p8, %p1264_p5 }
  0x38   :  { %1274 = shalt.err (!%p1271_p9)
}
  0x39   :  { %57 = dma.hbm_to_vmem [thread:$0]  %s1518_s3, 2048, %s52_s17, [#allocation7], %s1329_s22, %s1329_s22, %s1330_s23  }
  0x3a   :  { %s1275_s10 = scalar_lea.hbm %s1520_s5, 2048 }
  0x3b   :  { %p1276_p10 = scmp.ne.s32.totalorder %s1520_s5, %s1275_s10  ;;  %p1279_p11 = scmp.lt.u32.totalorder %s1275_s10, %s1520_s5 }
  0x3d   :  { %p1281_p12 = pnand %p1279_p11, %p1276_p10 }
  0x3f   :  { %1284 = shalt.err (!%p1281_p12)
}
  0x40   :  { %s1285_s15 = scalar_lea.vmem %s1430_s19, 2048  ;;  %p1290_p0 = scmp.lt.s32.totalorder %s1430_s19, %s1430_s19 }
  0x41   :  { %p1286_p13 = scmp.ne.s32.totalorder %s1430_s19, %s1285_s15  ;;  %p1291_p1 = scmp.lt.s32.totalorder %s1285_s15, %s1285_s15 }
  0x43   :  { %p1292_p2 = por %p1291_p1, %p1290_p0 }
  0x45   :  { %p1293_p3 = pnand %p1292_p2, %p1286_p13 }
  0x47   :  { %1296 = shalt.err (!%p1293_p3)
}
  0x48   :  { %71 = dma.hbm_to_vmem [thread:$0]  %s1520_s5, 2048, %s1430_s19, [#allocation10], %s1329_s22, %s1329_s22, %s1330_s23  }
  0x49   :  { %1319 = dma.done.wait [#allocation4], 2048  }
  0x4a   :  { %1320 = vsyncadd [#allocation4], 4294965248 }
  0x4b   :  { %1321 = dma.done.wait [#allocation7], 2560  }
  0x4c   :  { %1322 = vsyncadd [#allocation7], 4294964736 }
  0x4d   :  { %1323 = dma.done.wait [#allocation10], 2048  }
  0x4e   :  { %1324 = vsyncadd [#allocation10], 4294965248  ;;  %vm166_vm0 = vcmask 1045504   ;;  %vm117_vm1 = vcmask 244736   ;;  %v106_v1 = vld [vmem:[#allocation6] sm:$0xff]  ;;  %v107_v2 = vld [vmem:[#allocation6 + $0x8] sm:$0xff] }
  0x4f   :  { %v108_v3 = vld [vmem:[#allocation6 + $0x10] sm:$0xff]  ;;  %v1098_v4 = vpack.c.bf16 %v107_v2, %v106_v1  ;;  %v109_v5 = vld [vmem:[#allocation6 + $0x18] sm:$0x3f]  ;;  %v90_v6 = vld [vmem:[#allocation3] sm:$0xff]  ;;  %vm1333_vm2 = vmmov 1   ;;  %vm1335_vm4 = vmmov 0  }
  0x50   :  { %v1102_v7 = vpack.c.bf16 %v109_v5, %v108_v3  ;;  %vm1103_vm3 = vmpackc.low %vm166_vm0, %vm1333_vm2  ;;  %927 = vmatprep.mubr.msk.f32.mxu0 %vm117_vm1, %v90_v6  ;;  %v331_v8 = vld [vmem:[#allocation8] sm:$0xff]  ;;  %v332_v9 = vld [vmem:[#allocation8 + $0x8] sm:$0xff]  ;;  %s1338_s19 = smov [#allocation11]  }
  0x51   :  { %1099 = vmatprep.subr.bf16.mxu0 %v1098_v4  ;;  %v333_v10 = vld [vmem:[#allocation8 + $0x10] sm:$0xff]  ;;  %v334_v11 = vld [vmem:[#allocation8 + $0x18] sm:$0xff]  ;;  %v91_v12 = vld [vmem:[#allocation3 + $0x8] sm:$0xff]  ;;  %v1108_v13 = vpack.c.bf16 %v332_v9, %v331_v8  ;;  %s787_s8 = sshll.u32 %s1338_s19, 4  ;;  %s788_s8 = int_to_ptr.vmem [resolvable:$true] %s787_s8 }
  0x52   :  { %1101 = vmatpush3.bf16.msra.mxu0 %v1098_v4  ;;  %v1112_v14 = vpack.c.bf16 %v334_v11, %v333_v10  ;;  %v92_v15 = vld [vmem:[#allocation3 + $0x10] sm:$0xff]  ;;  %v335_v16 = vld [vmem:[#allocation8 + $0x20] sm:$0xff]  ;;  %v336_v17 = vld [vmem:[#allocation8 + $0x28] sm:$0xff]  ;;  %s1297_s20 = scalar_lea.vmem %s788_s8, 16  ;;  %s1301_s21 = scalar_lea.vmem %s788_s8, 32 }
  0x53   :  { %1104 = vmatprep.subr.msk.bf16.mxu0 %vm1103_vm3, %v1102_v7  ;;  %1109 = vmatprep.subr.bf16.mxu1 %v1108_v13  ;;  %v93_v18 = vld [vmem:[#allocation3 + $0x18] sm:$0xff]  ;;  %v1116_v19 = vpack.c.bf16 %v336_v17, %v335_v16  ;;  %v94_v20 = vld [vmem:[#allocation3 + $0x20] sm:$0xff]  ;;  %v337_v21 = vld [vmem:[#allocation8 + $0x30] sm:$0xff]  ;;  %p1298_p4 = scmp.ne.s32.totalorder %s788_s8, %s1297_s20  ;;  %p1302_p5 = scmp.lt.s32.totalorder %s788_s8, %s788_s8 }
  0x54   :  { %1111 = vmatpush3.bf16.msra.mxu1 %v1108_v13  ;;  %v338_v22 = vld [vmem:[#allocation8 + $0x38] sm:$0xff]  ;;  %v95_v23 = vld [vmem:[#allocation3 + $0x28] sm:$0xff]  ;;  %v96_v25 = vld [vmem:[#allocation3 + $0x30] sm:$0xff]  ;;  %p1303_p6 = scmp.lt.s32.totalorder %s1301_s21, %s1297_s20 }
  0x55   :  { %1113 = vmatprep.subr.bf16.mxu1 %v1112_v14  ;;  %v1120_v24 = vpack.c.bf16 %v338_v22, %v337_v21  ;;  %v339_v26 = vld [vmem:[#allocation8 + $0x40] sm:$0xff]  ;;  %v340_v27 = vld [vmem:[#allocation8 + $0x48] sm:$0xff]  ;;  %v97_v28 = vld [vmem:[#allocation3 + $0x38] sm:$0xff] }
  0x56   :  { %1107 = vmatpush3.bf16.msk.msra.mxu0 %vm1103_vm3, %v1102_v7  ;;  %v1124_v29 = vpack.c.bf16 %v340_v27, %v339_v26  ;;  %v98_v30 = vld [vmem:[#allocation3 + $0x40] sm:$0xff]  ;;  %v341_v31 = vld [vmem:[#allocation8 + $0x50] sm:$0xff]  ;;  %v342_v32 = vld [vmem:[#allocation8 + $0x58] sm:$0xff]  ;;  %p1304_p7 = por %p1303_p6, %p1302_p5 }
  0x57   :  { %v99_v33 = vld [vmem:[#allocation3 + $0x48] sm:$0xff]  ;;  %v1128_v34 = vpack.c.bf16 %v342_v32, %v341_v31  ;;  %v100_v35 = vld [vmem:[#allocation3 + $0x50] sm:$0xff]  ;;  %v343_v36 = vld [vmem:[#allocation8 + $0x60] sm:$0xff] }
  0x58   :  { %1115 = vmatpush3.bf16.msra.mxu1 %v1112_v14  ;;  %v344_v37 = vld [vmem:[#allocation8 + $0x68] sm:$0xff]  ;;  %v101_v38 = vld [vmem:[#allocation3 + $0x58] sm:$0xff]  ;;  %v102_v40 = vld [vmem:[#allocation3 + $0x60] sm:$0xff]  ;;  %p1305_p8 = pnand %p1304_p7, %p1298_p4 }
  0x59   :  { %928 = vmatmul.mubr.msk.f32.vlgmr.msra.gmra.mrb[0].mxu0 %vm117_vm1, %v91_v12  ;;  %1117 = vmatprep.subr.bf16.mxu1 %v1116_v19  ;;  %v1132_v39 = vpack.c.bf16 %v344_v37, %v343_v36  ;;  %v103_v41 = vld [vmem:[#allocation3 + $0x68] sm:$0xff]  ;;  %v104_v42 = vld [vmem:[#allocation3 + $0x70] sm:$0xff]  ;;  %v105_v43 = vld [vmem:[#allocation3 + $0x78] sm:$0xff] }
  0x5a   :  { %930 = vmatprep.mubr.msk.f32.mxu0 %vm117_vm1, %v92_v15  ;;  %v345_v44 = vld [vmem:[#allocation8 + $0x70] sm:$0xff]  ;;  %v346_v45 = vld [vmem:[#allocation8 + $0x78] sm:$0xff]  ;;  %v515_v47 = vld [vmem:[#allocation9] sm:$0xff] }
  0x5b   :  { %v1136_v46 = vpack.c.bf16 %v346_v45, %v345_v44  ;;  %v516_v48 = vld [vmem:[#allocation9 + $0x8] sm:$0xff]  ;;  %v517_v49 = vld [vmem:[#allocation9 + $0x10] sm:$0xff]  ;;  %v518_v51 = vld [vmem:[#allocation9 + $0x18] sm:$0xff] }
  0x5c   :  { %1119 = vmatpush3.bf16.msra.mxu1 %v1116_v19  ;;  %v1140_v50 = vpack.c.bf16 %v516_v48, %v515_v47  ;;  %v1144_v52 = vpack.c.bf16 %v518_v51, %v517_v49  ;;  %v519_v53 = vld [vmem:[#allocation9 + $0x20] sm:$0xff]  ;;  %v520_v54 = vld [vmem:[#allocation9 + $0x28] sm:$0xff]  ;;  %v521_v56 = vld [vmem:[#allocation9 + $0x30] sm:$0xff] }
  0x5d   :  { %931 = vmatmul.mubr.msk.f32.gmra.mrb[2].mxu0 %vm117_vm1, %v93_v18  ;;  %1121 = vmatprep.subr.bf16.mxu1 %v1120_v24  ;;  %v1148_v55 = vpack.c.bf16 %v520_v54, %v519_v53  ;;  %v522_v57 = vld [vmem:[#allocation9 + $0x38] sm:$0xff]  ;;  %v523_v59 = vld [vmem:[#allocation9 + $0x40] sm:$0xff]  ;;  %v524_v60 = vld [vmem:[#allocation9 + $0x48] sm:$0xff] }
  0x5e   :  { %933 = vmatprep.mubr.msk.f32.mxu0 %vm117_vm1, %v94_v20  ;;  %1141 = vmatprep.subr.bf16.mxu0 %v1140_v50  ;;  %v1152_v58 = vpack.c.bf16 %v522_v57, %v521_v56  ;;  %v1156_v61 = vpack.c.bf16 %v524_v60, %v523_v59  ;;  %v525_v62 = vld [vmem:[#allocation9 + $0x50] sm:$0xff]  ;;  %v526_v63 = vld [vmem:[#allocation9 + $0x58] sm:$0xff]  ;;  %v527_v1 = vld [vmem:[#allocation9 + $0x60] sm:$0xff] }
  0x5f   :  { %1143 = vmatpush3.bf16.msra.mxu0 %v1140_v50  ;;  %v1160_v0 = vpack.c.bf16 %v526_v63, %v525_v62  ;;  %v528_v2 = vld [vmem:[#allocation9 + $0x68] sm:$0xff]  ;;  %v798_v4 = vld [vmem:[%s1517_s2] ss:$0 sm:$0xff]  ;;  %v529_v53 = vld [vmem:[#allocation9 + $0x70] sm:$0xff] }
  0x60   :  { %1123 = vmatpush3.bf16.msra.mxu1 %v1120_v24  ;;  %1145 = vmatprep.subr.bf16.mxu0 %v1144_v52  ;;  %v1164_v3 = vpack.c.bf16 %v528_v2, %v527_v1  ;;  %v530_v54 = vld [vmem:[#allocation9 + $0x78] sm:$0xff] }
  0x61   :  { %934 = vmatmul.mubr.msk.f32.gmra.mrb[4].mxu0 %vm117_vm1, %v95_v23  ;;  %1125 = vmatprep.subr.bf16.mxu1 %v1124_v29  ;;  %v816_v56 = vld [vmem:[%s1519_s4] ss:$0 sm:$0xff] }
  0x62   :  { %936 = vmatprep.mubr.msk.f32.mxu0 %vm117_vm1, %v96_v25 }
  0x63   :  { %1147 = vmatpush3.bf16.msra.mxu0 %v1144_v52 }
  0x64   :  { %1127 = vmatpush3.bf16.msra.mxu1 %v1124_v29  ;;  %1149 = vmatprep.subr.bf16.mxu0 %v1148_v55 }
  0x65   :  { %937 = vmatmul.mubr.msk.f32.gmra.mrb[6].mxu0 %vm117_vm1, %v97_v28  ;;  %1129 = vmatprep.subr.bf16.mxu1 %v1128_v34 }
  0x66   :  { %939 = vmatprep.mubr.msk.f32.mxu0 %vm117_vm1, %v98_v30 }
  0x67   :  { %1151 = vmatpush3.bf16.msra.mxu0 %v1148_v55  ;;  %v1168_v55 = vpack.c.bf16 %v530_v54, %v529_v53 }
  0x68   :  { %1131 = vmatpush3.bf16.msra.mxu1 %v1128_v34  ;;  %1153 = vmatprep.subr.bf16.mxu0 %v1152_v58 }
  0x69   :  { %940 = vmatmul.mubr.msk.f32.gmra.mrb[8].mxu0 %vm117_vm1, %v99_v33  ;;  %1133 = vmatprep.subr.bf16.mxu1 %v1132_v39 }
  0x6a   :  { %942 = vmatprep.mubr.msk.f32.mxu0 %vm117_vm1, %v100_v35 }
  0x6b   :  { %1155 = vmatpush3.bf16.msra.mxu0 %v1152_v58 }
  0x6c   :  { %1135 = vmatpush3.bf16.msra.mxu1 %v1132_v39  ;;  %1157 = vmatprep.subr.bf16.mxu0 %v1156_v61 }
  0x6d   :  { %943 = vmatmul.mubr.msk.f32.gmra.mrb[10].mxu0 %vm117_vm1, %v101_v38  ;;  %1137 = vmatprep.subr.bf16.mxu1 %v1136_v46 }
  0x6e   :  { %945 = vmatprep.mubr.msk.f32.mxu0 %vm117_vm1, %v102_v40 }
  0x6f   :  { %1159 = vmatpush3.bf16.msra.mxu0 %v1156_v61 }
  0x70   :  { %1139 = vmatpush3.bf16.msra.mxu1 %v1136_v46  ;;  %1161 = vmatprep.subr.bf16.mxu0 %v1160_v0 }
  0x71   :  { %946 = vmatmul.mubr.msk.f32.gmra.mrb[12].mxu0 %vm117_vm1, %v103_v41 }
  0x72   :  { %948 = vmatprep.mubr.msk.f32.mxu0 %vm117_vm1, %v104_v42 }
  0x73   :  { %1163 = vmatpush3.bf16.msra.mxu0 %v1160_v0 }
  0x74   :  { %1165 = vmatprep.subr.bf16.mxu0 %v1164_v3 }
  0x75   :  { %949 = vmatmul.mubr.msk.f32.gmra.mrb[14].mxu0 %vm117_vm1, %v105_v43 }
  0x77   :  { %1167 = vmatpush3.bf16.msra.mxu0 %v1164_v3 }
  0x78   :  { %1169 = vmatprep.subr.bf16.mxu0 %v1168_v55 }
  0x7b   :  { %1171 = vmatpush3.bf16.msra.mxu0 %v1168_v55 }
 0x12c   :  { %v929_v5 = vpop.f32.mrb[0].mxu0 }
 0x12d   :  { %v242_v6 = vadd.f32 %v929_v5, %v798_v4  ;;  %v236_v7 = vpop.f32.mrb[1].mxu0 }
 0x12e   :  { %v237_v8 = vadd.f32 %v798_v4, %v236_v7 }
 0x12f   :  { %v316_v11 = vmax.f32 %v242_v6, 0.0 }
 0x130   :  { %v932_v9 = vpop.f32.mrb[2].mxu0  ;;  %v315_v10 = vmax.f32 %v237_v8, 0.0 }
 0x131   :  { %v252_v12 = vadd.f32 %v932_v9, %v798_v4  ;;  %v246_v13 = vpop.f32.mrb[3].mxu0 }
 0x132   :  { %v247_v14 = vadd.f32 %v798_v4, %v246_v13  ;;  %983 = vmatprep.mubr.f32.mxu1 %v315_v10 }
 0x133   :  { %v318_v15 = vmax.f32 %v252_v12, 0.0  ;;  %984 = vmatmul.mubr.f32.vlgmr.msra.gmra.mrb[0].mxu1 %v316_v11 }
 0x134   :  { %v317_v16 = vmax.f32 %v247_v14, 0.0  ;;  %v935_v17 = vpop.f32.mrb[4].mxu0 }
 0x135   :  { %v262_v18 = vadd.f32 %v935_v17, %v798_v4  ;;  %v256_v19 = vpop.f32.mrb[5].mxu0 }
 0x136   :  { %986 = vmatprep.mubr.f32.mxu1 %v317_v16  ;;  %v257_v20 = vadd.f32 %v798_v4, %v256_v19 }
 0x137   :  { %v320_v21 = vmax.f32 %v262_v18, 0.0  ;;  %987 = vmatmul.mubr.f32.gmra.mrb[2].mxu1 %v318_v15 }
 0x138   :  { %v319_v22 = vmax.f32 %v257_v20, 0.0  ;;  %v938_v23 = vpop.f32.mrb[6].mxu0 }
 0x139   :  { %v272_v24 = vadd.f32 %v938_v23, %v798_v4  ;;  %v266_v25 = vpop.f32.mrb[7].mxu0 }
 0x13a   :  { %989 = vmatprep.mubr.f32.mxu1 %v319_v22  ;;  %v267_v26 = vadd.f32 %v798_v4, %v266_v25 }
 0x13b   :  { %990 = vmatmul.mubr.f32.gmra.mrb[4].mxu1 %v320_v21  ;;  %v322_v27 = vmax.f32 %v272_v24, 0.0 }
 0x13c   :  { %v321_v28 = vmax.f32 %v267_v26, 0.0  ;;  %v941_v29 = vpop.f32.mrb[8].mxu0 }
 0x13d   :  { %v282_v30 = vadd.f32 %v941_v29, %v798_v4  ;;  %v276_v31 = vpop.f32.mrb[9].mxu0 }
 0x13e   :  { %992 = vmatprep.mubr.f32.mxu1 %v321_v28  ;;  %v277_v32 = vadd.f32 %v798_v4, %v276_v31 }
 0x13f   :  { %993 = vmatmul.mubr.f32.gmra.mrb[6].mxu1 %v322_v27  ;;  %v324_v33 = vmax.f32 %v282_v30, 0.0 }
 0x140   :  { %v323_v34 = vmax.f32 %v277_v32, 0.0  ;;  %v944_v35 = vpop.f32.mrb[10].mxu0 }
 0x141   :  { %v292_v36 = vadd.f32 %v944_v35, %v798_v4  ;;  %v286_v37 = vpop.f32.mrb[11].mxu0 }
 0x142   :  { %995 = vmatprep.mubr.f32.mxu1 %v323_v34  ;;  %v287_v38 = vadd.f32 %v798_v4, %v286_v37 }
 0x143   :  { %996 = vmatmul.mubr.f32.gmra.mrb[8].mxu1 %v324_v33  ;;  %v326_v39 = vmax.f32 %v292_v36, 0.0 }
 0x144   :  { %v325_v40 = vmax.f32 %v287_v38, 0.0  ;;  %v947_v41 = vpop.f32.mrb[12].mxu0 }
 0x145   :  { %v302_v42 = vadd.f32 %v947_v41, %v798_v4  ;;  %v296_v43 = vpop.f32.mrb[13].mxu0  ;;  %v1334_v41 = vmov 0.0|0.0  }
 0x146   :  { %998 = vmatprep.mubr.f32.mxu1 %v325_v40  ;;  %v297_v44 = vadd.f32 %v798_v4, %v296_v43  ;;  %1172 = vmatprep.subr.bf16.mxu1 %v1334_v41  ;;  %v700_v43 = vld [vmem:[#allocation2] sm:$0x1] }
 0x147   :  { %999 = vmatmul.mubr.f32.gmra.mrb[10].mxu1 %v326_v39  ;;  %v328_v45 = vmax.f32 %v302_v42, 0.0  ;;  %v1336_v42 = vmov 0.0  }
 0x148   :  { %v327_v46 = vmax.f32 %v297_v44, 0.0  ;;  %v950_v47 = vpop.f32.mrb[14].mxu0  ;;  %v1337_v44 = vmov 0  }
 0x149   :  { %v312_v48 = vadd.f32 %v950_v47, %v798_v4  ;;  %v306_v49 = vpop.f32.mrb[15].mxu0  ;;  %1208 = vset.pattern.permute.xlu0 %v1337_v44 }
 0x14a   :  { %1001 = vmatprep.mubr.f32.mxu1 %v327_v46  ;;  %v307_v50 = vadd.f32 %v798_v4, %v306_v49  ;;  %703 = vperm.xlu0 %1208, %v700_v43  }
 0x14b   :  { %1002 = vmatmul.mubr.f32.gmra.mrb[12].mxu1 %v328_v45  ;;  %v330_v51 = vmax.f32 %v312_v48, 0.0  ;;  %v817_v45 = vld [vmem:[%s1521_s6] ss:$0 sm:$0xff] }
 0x14c   :  { %v329_v52 = vmax.f32 %v307_v50, 0.0 }
 0x14e   :  { %1004 = vmatprep.mubr.f32.mxu1 %v329_v52 }
 0x14f   :  { %1005 = vmatmul.mubr.f32.gmra.mrb[14].mxu1 %v330_v51 }
 0x150   :  { %1095 = vmatprep.mubr.msk.f32.mxu1 %vm1335_vm4, %v1336_v42 }
 0x1c9   :  { %v704_v43 = vpop.permute.xlu0 %703 }
 0x206   :  { %v985_v57 = vpop.f32.mrb[0].mxu1 }
 0x207   :  { %v426_v58 = vadd.f32 %v985_v57, %v816_v56  ;;  %v420_v59 = vpop.f32.mrb[1].mxu1 }
 0x208   :  { %v421_v60 = vadd.f32 %v816_v56, %v420_v59 }
 0x209   :  { %v500_v63 = vmax.f32 %v426_v58, 0.0 }
 0x20a   :  { %v499_v61 = vmax.f32 %v421_v60, 0.0  ;;  %v988_v62 = vpop.f32.mrb[2].mxu1 }
 0x20b   :  { %v436_v0 = vadd.f32 %v988_v62, %v816_v56  ;;  %v430_v1 = vpop.f32.mrb[3].mxu1 }
 0x20c   :  { %v431_v2 = vadd.f32 %v816_v56, %v430_v1  ;;  %1039 = vmatprep.mubr.f32.mxu0 %v499_v61 }
 0x20d   :  { %v502_v3 = vmax.f32 %v436_v0, 0.0  ;;  %1040 = vmatmul.mubr.f32.vlgmr.msra.gmra.mrb[16].mxu0 %v500_v63 }
 0x20e   :  { %v501_v4 = vmax.f32 %v431_v2, 0.0  ;;  %v991_v5 = vpop.f32.mrb[4].mxu1 }
 0x20f   :  { %v446_v6 = vadd.f32 %v991_v5, %v816_v56  ;;  %v440_v7 = vpop.f32.mrb[5].mxu1 }
 0x210   :  { %1042 = vmatprep.mubr.f32.mxu0 %v501_v4  ;;  %v441_v8 = vadd.f32 %v816_v56, %v440_v7 }
 0x211   :  { %v504_v9 = vmax.f32 %v446_v6, 0.0  ;;  %1043 = vmatmul.mubr.f32.gmra.mrb[18].mxu0 %v502_v3 }
 0x212   :  { %v503_v10 = vmax.f32 %v441_v8, 0.0  ;;  %v994_v11 = vpop.f32.mrb[6].mxu1 }
 0x213   :  { %v456_v12 = vadd.f32 %v994_v11, %v816_v56  ;;  %v450_v13 = vpop.f32.mrb[7].mxu1 }
 0x214   :  { %1045 = vmatprep.mubr.f32.mxu0 %v503_v10  ;;  %v451_v14 = vadd.f32 %v816_v56, %v450_v13 }
 0x215   :  { %1046 = vmatmul.mubr.f32.gmra.mrb[20].mxu0 %v504_v9  ;;  %v506_v15 = vmax.f32 %v456_v12, 0.0 }
 0x216   :  { %v505_v16 = vmax.f32 %v451_v14, 0.0  ;;  %v997_v17 = vpop.f32.mrb[8].mxu1 }
 0x217   :  { %v466_v18 = vadd.f32 %v997_v17, %v816_v56  ;;  %v460_v19 = vpop.f32.mrb[9].mxu1 }
 0x218   :  { %1048 = vmatprep.mubr.f32.mxu0 %v505_v16  ;;  %v461_v20 = vadd.f32 %v816_v56, %v460_v19 }
 0x219   :  { %1049 = vmatmul.mubr.f32.gmra.mrb[22].mxu0 %v506_v15  ;;  %v508_v21 = vmax.f32 %v466_v18, 0.0 }
 0x21a   :  { %v507_v22 = vmax.f32 %v461_v20, 0.0  ;;  %v1000_v23 = vpop.f32.mrb[10].mxu1 }
 0x21b   :  { %v476_v24 = vadd.f32 %v1000_v23, %v816_v56  ;;  %v470_v25 = vpop.f32.mrb[11].mxu1 }
 0x21c   :  { %1051 = vmatprep.mubr.f32.mxu0 %v507_v22  ;;  %v471_v26 = vadd.f32 %v816_v56, %v470_v25 }
 0x21d   :  { %1052 = vmatmul.mubr.f32.gmra.mrb[24].mxu0 %v508_v21  ;;  %v510_v27 = vmax.f32 %v476_v24, 0.0 }
 0x21e   :  { %v509_v28 = vmax.f32 %v471_v26, 0.0  ;;  %v1003_v29 = vpop.f32.mrb[12].mxu1 }
 0x21f   :  { %v486_v30 = vadd.f32 %v1003_v29, %v816_v56  ;;  %v480_v31 = vpop.f32.mrb[13].mxu1 }
 0x220   :  { %1054 = vmatprep.mubr.f32.mxu0 %v509_v28  ;;  %v481_v32 = vadd.f32 %v816_v56, %v480_v31 }
 0x221   :  { %1055 = vmatmul.mubr.f32.gmra.mrb[26].mxu0 %v510_v27  ;;  %v512_v33 = vmax.f32 %v486_v30, 0.0 }
 0x222   :  { %v511_v34 = vmax.f32 %v481_v32, 0.0  ;;  %v1006_v35 = vpop.f32.mrb[14].mxu1 }
 0x223   :  { %v496_v36 = vadd.f32 %v1006_v35, %v816_v56  ;;  %v490_v37 = vpop.f32.mrb[15].mxu1 }
 0x224   :  { %1057 = vmatprep.mubr.f32.mxu0 %v511_v34  ;;  %v491_v38 = vadd.f32 %v816_v56, %v490_v37 }
 0x225   :  { %1058 = vmatmul.mubr.f32.gmra.mrb[28].mxu0 %v512_v33  ;;  %v514_v39 = vmax.f32 %v496_v36, 0.0 }
 0x226   :  { %v513_v40 = vmax.f32 %v491_v38, 0.0  ;;  %v699_v38 = vld [vmem:[%s1522_s7] sm:$0x1] }
 0x228   :  { %1060 = vmatprep.mubr.f32.mxu0 %v513_v40 }
 0x229   :  { %1061 = vmatmul.mubr.f32.gmra.mrb[30].mxu0 %v514_v39  ;;  %v706_v39 = vlaneseq }
 0x22b   :  { %v707_v40 = vshrl.u32 %v706_v39, 7 }
 0x22d   :  { %v708_v42 = vsub.s32 0, %v707_v40 }
 0x22f   :  { %v709_v44 = vrot.slane %v704_v43, %v708_v42 }
 0x2e0   :  { %v1041_v46 = vpop.f32.mrb[16].mxu0 }
 0x2e1   :  { %v610_v47 = vadd.f32 %v1041_v46, %v817_v45  ;;  %v604_v48 = vpop.f32.mrb[17].mxu0 }
 0x2e2   :  { %v605_v49 = vadd.f32 %v817_v45, %v604_v48 }
 0x2e3   :  { %v684_v50 = vmax.f32 %v610_v47, 0.0 }
 0x2e4   :  { %v683_v51 = vmax.f32 %v605_v49, 0.0  ;;  %v1044_v52 = vpop.f32.mrb[18].mxu0 }
 0x2e5   :  { %v620_v53 = vadd.f32 %v1044_v52, %v817_v45  ;;  %v614_v54 = vpop.f32.mrb[19].mxu0 }
 0x2e6   :  { %v1173_v55 = vpack.c.bf16 %v684_v50, %v683_v51  ;;  %v615_v56 = vadd.f32 %v817_v45, %v614_v54 }
 0x2e7   :  { %v686_v57 = vmax.f32 %v620_v53, 0.0 }
 0x2e8   :  { %v685_v58 = vmax.f32 %v615_v56, 0.0  ;;  %1174 = vmatpush3.bf16.xpose.msra.mxu1 %v1173_v55  ;;  %v1047_v59 = vpop.f32.mrb[20].mxu0 }
 0x2e9   :  { %v630_v60 = vadd.f32 %v1047_v59, %v817_v45  ;;  %v624_v61 = vpop.f32.mrb[21].mxu0  ;;  %1175 = vmatprep.subr.bf16.mxu1 %v1334_v41 }
 0x2ea   :  { %v1176_v62 = vpack.c.bf16 %v686_v57, %v685_v58  ;;  %v625_v63 = vadd.f32 %v817_v45, %v624_v61 }
 0x2eb   :  { %v688_v0 = vmax.f32 %v630_v60, 0.0 }
 0x2ec   :  { %v687_v1 = vmax.f32 %v625_v63, 0.0  ;;  %v1050_v2 = vpop.f32.mrb[22].mxu0 }
 0x2ed   :  { %v640_v3 = vadd.f32 %v1050_v2, %v817_v45  ;;  %v634_v4 = vpop.f32.mrb[23].mxu0 }
 0x2ee   :  { %v1179_v5 = vpack.c.bf16 %v688_v0, %v687_v1  ;;  %v635_v6 = vadd.f32 %v817_v45, %v634_v4 }
 0x2ef   :  { %v690_v7 = vmax.f32 %v640_v3, 0.0 }
 0x2f0   :  { %1177 = vmatpush3.bf16.xpose.msra.mxu1 %v1176_v62  ;;  %v689_v8 = vmax.f32 %v635_v6, 0.0  ;;  %v1053_v9 = vpop.f32.mrb[24].mxu0 }
 0x2f1   :  { %1178 = vmatprep.subr.bf16.mxu1 %v1334_v41  ;;  %v650_v10 = vadd.f32 %v1053_v9, %v817_v45  ;;  %v644_v11 = vpop.f32.mrb[25].mxu0 }
 0x2f2   :  { %v1182_v12 = vpack.c.bf16 %v690_v7, %v689_v8  ;;  %v645_v13 = vadd.f32 %v817_v45, %v644_v11 }
 0x2f3   :  { %v692_v14 = vmax.f32 %v650_v10, 0.0 }
 0x2f4   :  { %v691_v15 = vmax.f32 %v645_v13, 0.0  ;;  %v1056_v16 = vpop.f32.mrb[26].mxu0 }
 0x2f5   :  { %v660_v17 = vadd.f32 %v1056_v16, %v817_v45  ;;  %v654_v18 = vpop.f32.mrb[27].mxu0 }
 0x2f6   :  { %v1185_v19 = vpack.c.bf16 %v692_v14, %v691_v15  ;;  %v655_v20 = vadd.f32 %v817_v45, %v654_v18 }
 0x2f7   :  { %v694_v21 = vmax.f32 %v660_v17, 0.0 }
 0x2f8   :  { %1180 = vmatpush3.bf16.xpose.msra.mxu1 %v1179_v5  ;;  %v693_v22 = vmax.f32 %v655_v20, 0.0  ;;  %v1059_v23 = vpop.f32.mrb[28].mxu0 }
 0x2f9   :  { %1181 = vmatprep.subr.bf16.mxu1 %v1334_v41  ;;  %v670_v24 = vadd.f32 %v1059_v23, %v817_v45  ;;  %v664_v25 = vpop.f32.mrb[29].mxu0 }
 0x2fa   :  { %v1188_v26 = vpack.c.bf16 %v694_v21, %v693_v22  ;;  %v665_v27 = vadd.f32 %v817_v45, %v664_v25 }
 0x2fb   :  { %v696_v28 = vmax.f32 %v670_v24, 0.0 }
 0x2fc   :  { %v695_v29 = vmax.f32 %v665_v27, 0.0  ;;  %v1062_v30 = vpop.f32.mrb[30].mxu0 }
 0x2fd   :  { %v680_v31 = vadd.f32 %v1062_v30, %v817_v45  ;;  %v674_v32 = vpop.f32.mrb[31].mxu0 }
 0x2fe   :  { %v1191_v33 = vpack.c.bf16 %v696_v28, %v695_v29  ;;  %v675_v34 = vadd.f32 %v817_v45, %v674_v32 }
 0x2ff   :  { %v698_v35 = vmax.f32 %v680_v31, 0.0 }
 0x300   :  { %1183 = vmatpush3.bf16.xpose.msra.mxu1 %v1182_v12  ;;  %v697_v36 = vmax.f32 %v675_v34, 0.0 }
 0x301   :  { %1184 = vmatprep.subr.bf16.mxu1 %v1334_v41 }
 0x302   :  { %v1194_v37 = vpack.c.bf16 %v698_v35, %v697_v36 }
 0x308   :  { %1186 = vmatpush3.bf16.xpose.msra.mxu1 %v1185_v19 }
 0x309   :  { %1187 = vmatprep.subr.bf16.mxu1 %v1334_v41 }
 0x310   :  { %1189 = vmatpush3.bf16.xpose.msra.mxu1 %v1188_v26 }
 0x311   :  { %1190 = vmatprep.subr.bf16.mxu1 %v1334_v41 }
 0x318   :  { %1192 = vmatpush3.bf16.xpose.msra.mxu1 %v1191_v33 }
 0x319   :  { %1193 = vmatprep.subr.bf16.mxu1 %v1334_v41 }
 0x320   :  { %1195 = vmatpush3.bf16.xpose.msra.mxu1 %v1194_v37 }
 0x327   :  { %1096 = vmatmul.mubr.f32.vlgmr.msra.gmra.mrb[16].mxu1 %v699_v38 }
 0x3fa   :  { %v776_v45 = vpop.f32.mrb[16].mxu1 }
 0x3fb   :  { %v777_v46 = vadd.f32 %v776_v45, %v709_v44  ;;  %v1097_v47 = vpop.f32.mrb[17].mxu1 }
 0x3fd   :  { %780 = vst [vmem:[#allocation11] sm:$0x1] %v777_v46 }
 0x3fe   :  { %1308 = shalt.err (!%p1305_p8)
}
 0x3ff   :  { %s1309_s25 = scalar_lea.hbm %s1524_s9, 16 }
 0x400   :  { %p1310_p9 = scmp.ne.s32.totalorder %s1524_s9, %s1309_s25  ;;  %p1313_p10 = scmp.lt.u32.totalorder %s1309_s25, %s1524_s9 }
 0x402   :  { %p1315_p11 = pnand %p1313_p10, %p1310_p9 }
 0x404   :  { %1318 = shalt.err (!%p1315_p11)
}
 0x405   :  { %790 = dma.vmem_to_hbm [thread:$0]  %s788_s8, 16, %s1524_s9, [#allocation5]  }
 0x406   :  { %1325 = dma.done.wait [#allocation5], 16  }
 0x407   :  { %1326 = vsyncadd [#allocation5], 4294967280 }
 0x408   :  { %794 = vsyncpa [#allocation4], 1 }
 0x409   :  { %795 = vsyncpa [#allocation7], 1 }
 0x40a   :  { %796 = vsyncpa [#allocation10], 1 }
 0x40b   :  { %797 = vsyncpa [#allocation5], 1 }

</bundles_post_ra>
